<compile_context>
chip_gen: v7x
topology: tpu7x:2x2x1
jax: 0.10.0
libtpu: 0.0.40
codegen_flags: <defaults>
</compile_context>

<pallas_src>
import functools

import jax
import jax.numpy as jnp
from jax import lax
from jax.experimental import pallas as pl
from jax.experimental.pallas import tpu as pltpu

_LANE = 128
_SUBLANE = 8


def _chunk_plan(dims, width):
    """Static per-dim plan of 128-lane-aligned feature chunks.

    For each nested dim d (ascending): an `advance` chunk [alo, ahi) that moves
    the running prefix accumulator to the aligned boundary below d, plus an
    optional lane-masked partial chunk [clo, chi) with mask length `mlen`
    covering the sub-128 remainder of the prefix.
    """
    plan = []
    lo = 0
    for d in dims:
        d_floor = (d // _LANE) * _LANE
        adv = (lo, d_floor) if d_floor > lo else (lo, lo)
        lo = max(lo, d_floor)
        if d == lo:
            part = (lo, lo, 0)                        # aligned: prefix == acc
        else:
            part = (lo, min(lo + _LANE, width), d - lo)
        plan.append((adv, part))
    return tuple(plan)


def _mrl_flash_kernel(*refs, plan, scale, use_neg):
    """Per (row tile, candidate block) step of the fused MRL InfoNCE loss."""
    if use_neg:
        q_ref, pdiag_ref, p_ref, n_ref, out_ref, m_sc, l_sc = refs
    else:
        q_ref, pdiag_ref, p_ref, out_ref, m_sc, l_sc = refs
        n_ref = None

    k = pl.program_id(1)
    tb = q_ref.shape[0]
    lane = out_ref.shape[-1]
    nt = (((1,), (1,)), ((), ()))   # contract features: [tb,c] x [R,c] -> [tb,R]

    @pl.when(k == 0)
    def _init():
        m_sc[...] = jnp.full(m_sc.shape, -jnp.inf, dtype=m_sc.dtype)
        l_sc[...] = jnp.zeros(l_sc.shape, dtype=l_sc.dtype)

    # Fold the temperature scale into q once; keep native dtype for the MXU.
    q = q_ref[...] * jnp.asarray(scale, dtype=q_ref.dtype)
    p = p_ref[...]
    n = n_ref[...] if use_neg else None

    def masked_chunk(x, lo, hi, mlen):
        xc = x[:, lo:hi]
        if mlen >= hi - lo:
            return xc
        lane_ids = lax.broadcasted_iota(jnp.int32, (1, hi - lo), 1)
        return jnp.where(lane_ids < mlen, xc, jnp.zeros((), dtype=xc.dtype))

    acc_p = jnp.zeros((tb, p.shape[0]), jnp.float32)
    acc_n = jnp.zeros((tb, n.shape[0]), jnp.float32) if use_neg else None

    # Online (flash-style) per-dim logsumexp update over this candidate block.
    for j, ((alo, ahi), (clo, chi, mlen)) in enumerate(plan):
        if ahi > alo:                 # advance prefix acc over an aligned chunk
            qa = q[:, alo:ahi]
            acc_p = acc_p + lax.dot_general(
                qa, p[:, alo:ahi], nt, preferred_element_type=jnp.float32)
            if use_neg:
                acc_n = acc_n + lax.dot_general(
                    qa, n[:, alo:ahi], nt, preferred_element_type=jnp.float32)
        if chi > clo:                 # lane-masked sub-128 prefix remainder
            qm = masked_chunk(q, clo, chi, mlen)
            s_p = acc_p + lax.dot_general(
                qm, p[:, clo:chi], nt, preferred_element_type=jnp.float32)
            s_n = (acc_n + lax.dot_general(
                qm, n[:, clo:chi], nt, preferred_element_type=jnp.float32)
            ) if use_neg else None
        else:
            s_p, s_n = acc_p, acc_n

        bmax = jnp.max(s_p, axis=-1, keepdims=True)
        if use_neg:
            bmax = jnp.maximum(bmax, jnp.max(s_n, axis=-1, keepdims=True))
        m_old = m_sc[j]
        m_new = jnp.maximum(m_old, bmax)
        se = jnp.sum(jnp.exp(s_p - m_new), axis=-1, keepdims=True)
        if use_neg:
            se = se + jnp.sum(jnp.exp(s_n - m_new), axis=-1, keepdims=True)
        m_sc[j] = m_new
        l_sc[j] = l_sc[j] * jnp.exp(m_old - m_new) + se

    # Last candidate block: add the diagonal (correct-pair) logits and emit the
    # per-dim loss sums for this row tile as a lane/sublane-dense block.
    @pl.when(k == pl.num_programs(1) - 1)
    def _finalize():
        pdiag = pdiag_ref[...]
        col = lax.broadcasted_iota(jnp.int32, (1, 1, lane), 2)
        out_acc = jnp.zeros((1, _SUBLANE, lane), jnp.float32)
        dacc = jnp.zeros((tb, 1), jnp.float32)
        for j, ((alo, ahi), (clo, chi, mlen)) in enumerate(plan):
            if ahi > alo:
                dacc = dacc + jnp.sum(
                    q[:, alo:ahi].astype(jnp.float32)
                    * pdiag[:, alo:ahi].astype(jnp.float32),
                    axis=-1, keepdims=True)
            if chi > clo:
                qm = masked_chunk(q, clo, chi, mlen).astype(jnp.float32)
                diag_j = dacc + jnp.sum(
                    qm * pdiag[:, clo:chi].astype(jnp.float32),
                    axis=-1, keepdims=True)
            else:
                diag_j = dacc
            lse_j = m_sc[j] + jnp.log(l_sc[j])
            tile_loss = jnp.sum(lse_j - diag_j)          # 0-d f32
            out_acc = out_acc + jnp.where(col == j, tile_loss, 0.0)
        out_ref[...] = out_acc


def _largest_divisor_tile(total, target):
    """Largest multiple-of-8 divisor of `total` that is <= target, else total."""
    for t in range(min(target, total), 0, -1):
        if total % t == 0 and t % _SUBLANE == 0:
            return t
    return total


def _valid_cand_blockings(n_pos, n_neg):
    """Block counts c giving whole, multiple-of-8 blocks for pos (and neg)."""
    out = [1]
    for c in range(2, n_pos + 1):
        if n_pos % c or (n_pos // c) % _SUBLANE:
            continue
        if n_neg is not None and (n_neg % c or (n_neg // c) % _SUBLANE):
            continue
        out.append(c)
    return out


def _tpu_vmem_limit():
    """Generation-aware (limit, physical) VMEM bytes with compiler headroom."""
    try:
        phys = int(pltpu.get_tpu_info().vmem_capacity_bytes)
    except Exception:                        # query unavailable: assume v7x-sized
        phys = 64 * 1024 * 1024
    return (phys * 3) // 4, phys             # ~48 MiB on v7x, ~96 MiB on v5e/v6e


def mrl_loss(query_embeddings, positive_embeddings, negative_embeddings=None,
             *, mrl_nested_dim=(8, 16, 32), temperature=0.05):
    """JAX/Pallas equivalent of MRLLoss.forward with an InfoNCE criterion."""
    q, p, n = query_embeddings, positive_embeddings, negative_embeddings
    assert q.ndim == 2 and p.shape == q.shape
    B, D = q.shape
    use_neg = n is not None
    n_neg = None
    if use_neg:
        assert n.ndim == 2 and n.shape[1] == D
        n_neg = n.shape[0]

    scale = 1.0 / float(temperature)
    dims_eff = [min(int(d), D) for d in mrl_nested_dim]
    unique_dims = tuple(sorted(set(dims_eff)))
    n_dims = len(unique_dims)
    assert n_dims <= _LANE
    dmax = unique_dims[-1]

    # Carve only the needed feature columns straight from HBM via BlockSpec
    # (no wrapper-side slice copy): round up to a 128-lane boundary if it fits.
    if dmax == D:
        width = D
    else:
        w128 = -(-dmax // _LANE) * _LANE
        width = w128 if w128 <= D else D

    vmem_limit, phys_vmem = _tpu_vmem_limit()
    small_vmem = phys_vmem <= 64 * 1024 * 1024        # v7x-class chips
    row_target = 128 if small_vmem else 256
    if small_vmem:
        # Prefer >=2 row tiles so both v7x TensorCores get "parallel" work.
        row_target = min(row_target, max(_SUBLANE, B // 2))
    tile_b = _largest_divisor_tile(B, row_target)
    num_row_tiles = B // tile_b

    itemsize = jnp.dtype(q.dtype).itemsize
    budget = int(vmem_limit * 0.7)

    def vmem_estimate(bc, bcn):
        b = 4 * tile_b * width * itemsize                        # q + p_diag
        b += 2 * (bc + bcn) * width * itemsize                   # candidate blocks
        b += 4 * n_dims * tile_b * 4 + 2 * _SUBLANE * _LANE * 4  # scratch + out
        b += 8 * tile_b * (bc + bcn) * 4                         # f32 logits/exp temps
        return b

    blockings = _valid_cand_blockings(B, n_neg)
    ncb = blockings[-1]                                          # best-effort fallback
    for c in blockings:
        if vmem_estimate(B // c, (n_neg // c) if use_neg else 0) <= budget:
            ncb = c
            break
    bc = B // ncb
    bcn = (n_neg // ncb) if use_neg else 0

    kernel = functools.partial(_mrl_flash_kernel,
                               plan=_chunk_plan(unique_dims, width),
                               scale=scale, use_neg=use_neg)

    def spec(shape, index_map, constant_index):
        # Single-buffer blocks whose index never changes over the grid.
        if constant_index:
            return pl.BlockSpec(shape, index_map, pipeline_mode=pl.Buffered(1))
        return pl.BlockSpec(shape, index_map)

    in_specs = [
        spec((tile_b, width), lambda i, k: (i, 0), num_row_tiles == 1),  # q
        spec((tile_b, width), lambda i, k: (i, 0), num_row_tiles == 1),  # p diag
        spec((bc, width), lambda i, k: (k, 0), ncb == 1),                # p blocks
    ]
    operands = [q, p, p]
    if use_neg:
        in_specs.append(spec((bcn, width), lambda i, k: (k, 0), ncb == 1))
        operands.append(n)

    out = pl.pallas_call(
        kernel,
        grid=(num_row_tiles, ncb),
        in_specs=in_specs,
        out_specs=pl.BlockSpec((1, _SUBLANE, _LANE), lambda i, k: (i, 0, 0)),
        out_shape=jax.ShapeDtypeStruct((num_row_tiles, _SUBLANE, _LANE),
                                       jnp.float32),
        scratch_shapes=[pltpu.VMEM((n_dims, tile_b, 1), jnp.float32),
                        pltpu.VMEM((n_dims, tile_b, 1), jnp.float32)],
        compiler_params=pltpu.CompilerParams(
            dimension_semantics=("parallel", "arbitrary"),
            vmem_limit_bytes=vmem_limit),
    )(*operands)

    # Tiny final reduction in the wrapper: sum row tiles, mean over the batch,
    # then average over the (possibly duplicated) nested dims of the spec.
    per_dim = jnp.sum(out[:, 0, :n_dims], axis=0) / jnp.float32(B)
    uidx = {d: i for i, d in enumerate(unique_dims)}
    sel = jnp.asarray([uidx[d] for d in dims_eff], dtype=jnp.int32)
    return jnp.sum(per_dim[sel]) / jnp.float32(len(mrl_nested_dim))


def _reference_loss(q, p, n, mrl_nested_dim, temperature=0.05):
    """Pure-JAX reference for sanity checking."""
    scale = 1.0 / temperature
    B, D = q.shape
    total = 0.0
    for d in mrl_nested_dim:
        d = min(d, D)
        qd, pd = q[:, :d], p[:, :d]
        cand = pd if n is None else jnp.concatenate([pd, n[:, :d]], axis=0)
        logits = scale * qd @ cand.T
        logp = jax.nn.log_softmax(logits, axis=-1)
        total = total + jnp.mean(-logp[jnp.arange(B), jnp.arange(B)])
    return total / len(mrl_nested_dim)


if __name__ == "__main__":
    key = jax.random.PRNGKey(0)
    k1, k2, k3, k4 = jax.random.split(key, 4)

    B, D = 8, 32
    mrl_nested_dim = (8, 16, 32)

    query = jax.random.normal(k1, (B, D), dtype=jnp.float32)
    positive = jax.random.normal(k2, (B, D), dtype=jnp.float32)
    negative = jax.random.normal(k3, (B, D), dtype=jnp.float32)
    negative_2b = jax.random.normal(k4, (2 * B, D), dtype=jnp.float32)

    # In-batch negatives (Nn == B).
    loss = jax.block_until_ready(
        mrl_loss(query, positive, negative, mrl_nested_dim=mrl_nested_dim))
    ref = _reference_loss(query, positive, negative, mrl_nested_dim)
    assert jnp.allclose(loss, ref, rtol=2e-4, atol=2e-4), (loss, ref)

    # negative_embeddings=None path (kernel variant without the n input).
    loss_nn = jax.block_until_ready(
        mrl_loss(query, positive, None, mrl_nested_dim=mrl_nested_dim))
    ref_nn = _reference_loss(query, positive, None, mrl_nested_dim)
    assert jnp.allclose(loss_nn, ref_nn, rtol=2e-4, atol=2e-4), (loss_nn, ref_nn)

    # Negatives with a different row count than the batch (Nn = 2B).
    loss_2b = jax.block_until_ready(
        mrl_loss(query, positive, negative_2b, mrl_nested_dim=mrl_nested_dim))
    ref_2b = _reference_loss(query, positive, negative_2b, mrl_nested_dim)
    assert jnp.allclose(loss_2b, ref_2b, rtol=2e-4, atol=2e-4), (loss_2b, ref_2b)

    print("KERNEL_OK")
</pallas_src>

<mosaic_0001>
module attributes {stable_mosaic.version = 11 : i64} {
  func.func @_mrl_flash_kernel(%arg0: i32, %arg1: i32, %arg2: memref<8x32xf32, #tpu.memory_space<vmem>>, %arg3: memref<8x32xf32, #tpu.memory_space<vmem>>, %arg4: memref<8x32xf32, #tpu.memory_space<vmem>>, %arg5: memref<8x32xf32, #tpu.memory_space<vmem>>, %arg6: memref<1x8x128xf32, #tpu.memory_space<vmem>>, %arg7: memref<3x8x1xf32, #tpu.memory_space<vmem>>, %arg8: memref<3x8x1xf32, #tpu.memory_space<vmem>>) attributes {dimension_semantics = [#tpu.dimension_semantics<parallel>, #tpu.dimension_semantics<arbitrary>], iteration_bounds = array<i64: 1, 1>, scalar_prefetch = 0 : i64, scratch_operands = 2 : i64, tpu.core_type = #tpu.core_type<tc>, window_params = [{pipeline_mode = #tpu.pipeline_mode<synchronous>, transform_indices = @transform_0, window_bounds = array<i64: 8, 32>}, {pipeline_mode = #tpu.pipeline_mode<synchronous>, transform_indices = @transform_1, window_bounds = array<i64: 8, 32>}, {pipeline_mode = #tpu.pipeline_mode<synchronous>, transform_indices = @transform_2, window_bounds = array<i64: 8, 32>}, {pipeline_mode = #tpu.pipeline_mode<synchronous>, transform_indices = @transform_3, window_bounds = array<i64: 8, 32>}, {transform_indices = @transform_4, window_bounds = array<i64: 1, 8, 128>}]} {
    %c0_i32 = arith.constant 0 : i32
    %0 = arith.cmpi eq, %arg1, %c0_i32 : i32
    %1 = arith.extui %0 : i1 to i32
    %c0_i32_0 = arith.constant 0 : i32
    %2 = arith.cmpi ne, %1, %c0_i32_0 : i32
    scf.if %2 {
      %cst_64 = arith.constant 0xFF800000 : f32
      %132 = vector.broadcast %cst_64 : f32 to vector<3x8x1xf32>
      %c0_65 = arith.constant 0 : index
      %c0_66 = arith.constant 0 : index
      %c0_67 = arith.constant 0 : index
      %133 = vector.load %arg7[%c0_65, %c0_66, %c0_67] : memref<3x8x1xf32, #tpu.memory_space<vmem>>, vector<3x8x1xf32>
      tpu.vector_store %arg7[%c0_65, %c0_66, %c0_67], %132 {strides = array<i32>} : memref<3x8x1xf32, #tpu.memory_space<vmem>>, vector<3x8x1xf32>,
      %cst_68 = arith.constant 0.000000e+00 : f32
      %134 = vector.broadcast %cst_68 : f32 to vector<3x8x1xf32>
      %c0_69 = arith.constant 0 : index
      %c0_70 = arith.constant 0 : index
      %c0_71 = arith.constant 0 : index
      %135 = vector.load %arg8[%c0_69, %c0_70, %c0_71] : memref<3x8x1xf32, #tpu.memory_space<vmem>>, vector<3x8x1xf32>
      tpu.vector_store %arg8[%c0_69, %c0_70, %c0_71], %134 {strides = array<i32>} : memref<3x8x1xf32, #tpu.memory_space<vmem>>, vector<3x8x1xf32>,
    } else {
    }
    %c0 = arith.constant 0 : index
    %c0_1 = arith.constant 0 : index
    %3 = vector.load %arg2[%c0, %c0_1] : memref<8x32xf32, #tpu.memory_space<vmem>>, vector<8x32xf32>
    %cst = arith.constant 2.000000e+01 : f32
    %4 = vector.broadcast %cst : f32 to vector<8x32xf32>
    %5 = arith.mulf %3, %4 : vector<8x32xf32>
    %c0_2 = arith.constant 0 : index
    %c0_3 = arith.constant 0 : index
    %6 = vector.load %arg4[%c0_2, %c0_3] : memref<8x32xf32, #tpu.memory_space<vmem>>, vector<8x32xf32>
    %c0_4 = arith.constant 0 : index
    %c0_5 = arith.constant 0 : index
    %7 = vector.load %arg5[%c0_4, %c0_5] : memref<8x32xf32, #tpu.memory_space<vmem>>, vector<8x32xf32>
    %cst_6 = arith.constant 0.000000e+00 : f32
    %8 = vector.broadcast %cst_6 : f32 to vector<8x8xf32>
    %cst_7 = arith.constant 0.000000e+00 : f32
    %9 = vector.broadcast %cst_7 : f32 to vector<8x8xf32>
    %10 = tpu.iota {dimensions = array<i32: 1>} : vector<1x32xi32>
    %c8_i32 = arith.constant 8 : i32
    %11 = vector.broadcast %c8_i32 : i32 to vector<1x32xi32>
    %12 = arith.cmpi slt, %10, %11 : vector<1x32xi32>
    %cst_8 = arith.constant 0.000000e+00 : f32
    %13 = vector.shape_cast %12 : vector<1x32xi1> to vector<1x32xi1>
    %14 = vector.broadcast %13 : vector<1x32xi1> to vector<8x32xi1>
    %15 = vector.broadcast %cst_8 : f32 to vector<8x32xf32>
    %16 = arith.select %14, %5, %15 : vector<8x32xi1>, vector<8x32xf32>
    %cst_9 = arith.constant dense<0.000000e+00> : vector<8x8xf32>
    %17 = tpu.matmul %16, %6, %cst_9 {dimension_numbers = #tpu.dot_dimension_numbers<[1], [1], [0], [0], [0, 0, 1, 0], [], []>} : vector<8x32xf32>, vector<8x32xf32>, vector<8x8xf32> -> vector<8x8xf32>
    %18 = arith.addf %8, %17 : vector<8x8xf32>
    %cst_10 = arith.constant dense<0.000000e+00> : vector<8x8xf32>
    %19 = tpu.matmul %16, %7, %cst_10 {dimension_numbers = #tpu.dot_dimension_numbers<[1], [1], [0], [0], [0, 0, 1, 0], [], []>} : vector<8x32xf32>, vector<8x32xf32>, vector<8x8xf32> -> vector<8x8xf32>
    %20 = arith.addf %9, %19 : vector<8x8xf32>
    %cst_11 = arith.constant dense<0xFF800000> : vector<8xf32>
    %21 = vector.multi_reduction <maximumf>, %18, %cst_11 [1] : vector<8x8xf32> to vector<8xf32>
    %22 = vector.shape_cast %21 : vector<8xf32> to vector<8x1xf32>
    %cst_12 = arith.constant dense<0xFF800000> : vector<8xf32>
    %23 = vector.multi_reduction <maximumf>, %20, %cst_12 [1] : vector<8x8xf32> to vector<8xf32>
    %24 = vector.shape_cast %23 : vector<8xf32> to vector<8x1xf32>
    %25 = arith.maximumf %22, %24 : vector<8x1xf32>
    %c0_13 = arith.constant 0 : index
    %c0_14 = arith.constant 0 : index
    %c0_15 = arith.constant 0 : index
    %26 = vector.load %arg7[%c0_13, %c0_14, %c0_15] : memref<3x8x1xf32, #tpu.memory_space<vmem>>, vector<1x8x1xf32>
    %27 = vector.shape_cast %26 : vector<1x8x1xf32> to vector<8x1xf32>
    %28 = arith.maximumf %27, %25 : vector<8x1xf32>
    %29 = vector.broadcast %28 : vector<8x1xf32> to vector<8x8xf32>
    %30 = arith.subf %18, %29 : vector<8x8xf32>
    %31 = math.exp %30 : vector<8x8xf32>
    %cst_16 = arith.constant dense<0.000000e+00> : vector<8xf32>
    %32 = vector.multi_reduction <add>, %31, %cst_16 [1] : vector<8x8xf32> to vector<8xf32>
    %33 = vector.shape_cast %32 : vector<8xf32> to vector<8x1xf32>
    %34 = vector.broadcast %28 : vector<8x1xf32> to vector<8x8xf32>
    %35 = arith.subf %20, %34 : vector<8x8xf32>
    %36 = math.exp %35 : vector<8x8xf32>
    %cst_17 = arith.constant dense<0.000000e+00> : vector<8xf32>
    %37 = vector.multi_reduction <add>, %36, %cst_17 [1] : vector<8x8xf32> to vector<8xf32>
    %38 = vector.shape_cast %37 : vector<8xf32> to vector<8x1xf32>
    %39 = arith.addf %33, %38 : vector<8x1xf32>
    %c0_18 = arith.constant 0 : index
    %c0_19 = arith.constant 0 : index
    %c0_20 = arith.constant 0 : index
    %40 = vector.load %arg7[%c0_18, %c0_19, %c0_20] : memref<3x8x1xf32, #tpu.memory_space<vmem>>, vector<1x8x1xf32>
    %41 = vector.shape_cast %40 : vector<1x8x1xf32> to vector<8x1xf32>
    %42 = vector.shape_cast %28 : vector<8x1xf32> to vector<1x8x1xf32>
    tpu.vector_store %arg7[%c0_18, %c0_19, %c0_20], %42 {strides = array<i32>} : memref<3x8x1xf32, #tpu.memory_space<vmem>>, vector<1x8x1xf32>,
    %c0_21 = arith.constant 0 : index
    %c0_22 = arith.constant 0 : index
    %c0_23 = arith.constant 0 : index
    %43 = vector.load %arg8[%c0_21, %c0_22, %c0_23] : memref<3x8x1xf32, #tpu.memory_space<vmem>>, vector<1x8x1xf32>
    %44 = vector.shape_cast %43 : vector<1x8x1xf32> to vector<8x1xf32>
    %45 = arith.subf %27, %28 : vector<8x1xf32>
    %46 = math.exp %45 : vector<8x1xf32>
    %47 = arith.mulf %44, %46 : vector<8x1xf32>
    %48 = arith.addf %47, %39 : vector<8x1xf32>
    %c0_24 = arith.constant 0 : index
    %c0_25 = arith.constant 0 : index
    %c0_26 = arith.constant 0 : index
    %49 = vector.load %arg8[%c0_24, %c0_25, %c0_26] : memref<3x8x1xf32, #tpu.memory_space<vmem>>, vector<1x8x1xf32>
    %50 = vector.shape_cast %49 : vector<1x8x1xf32> to vector<8x1xf32>
    %51 = vector.shape_cast %48 : vector<8x1xf32> to vector<1x8x1xf32>
    tpu.vector_store %arg8[%c0_24, %c0_25, %c0_26], %51 {strides = array<i32>} : memref<3x8x1xf32, #tpu.memory_space<vmem>>, vector<1x8x1xf32>,
    %52 = tpu.iota {dimensions = array<i32: 1>} : vector<1x32xi32>
    %c16_i32 = arith.constant 16 : i32
    %53 = vector.broadcast %c16_i32 : i32 to vector<1x32xi32>
    %54 = arith.cmpi slt, %52, %53 : vector<1x32xi32>
    %cst_27 = arith.constant 0.000000e+00 : f32
    %55 = vector.shape_cast %54 : vector<1x32xi1> to vector<1x32xi1>
    %56 = vector.broadcast %55 : vector<1x32xi1> to vector<8x32xi1>
    %57 = vector.broadcast %cst_27 : f32 to vector<8x32xf32>
    %58 = arith.select %56, %5, %57 : vector<8x32xi1>, vector<8x32xf32>
    %cst_28 = arith.constant dense<0.000000e+00> : vector<8x8xf32>
    %59 = tpu.matmul %58, %6, %cst_28 {dimension_numbers = #tpu.dot_dimension_numbers<[1], [1], [0], [0], [0, 0, 1, 0], [], []>} : vector<8x32xf32>, vector<8x32xf32>, vector<8x8xf32> -> vector<8x8xf32>
    %60 = arith.addf %8, %59 : vector<8x8xf32>
    %cst_29 = arith.constant dense<0.000000e+00> : vector<8x8xf32>
    %61 = tpu.matmul %58, %7, %cst_29 {dimension_numbers = #tpu.dot_dimension_numbers<[1], [1], [0], [0], [0, 0, 1, 0], [], []>} : vector<8x32xf32>, vector<8x32xf32>, vector<8x8xf32> -> vector<8x8xf32>
    %62 = arith.addf %9, %61 : vector<8x8xf32>
    %cst_30 = arith.constant dense<0xFF800000> : vector<8xf32>
    %63 = vector.multi_reduction <maximumf>, %60, %cst_30 [1] : vector<8x8xf32> to vector<8xf32>
    %64 = vector.shape_cast %63 : vector<8xf32> to vector<8x1xf32>
    %cst_31 = arith.constant dense<0xFF800000> : vector<8xf32>
    %65 = vector.multi_reduction <maximumf>, %62, %cst_31 [1] : vector<8x8xf32> to vector<8xf32>
    %66 = vector.shape_cast %65 : vector<8xf32> to vector<8x1xf32>
    %67 = arith.maximumf %64, %66 : vector<8x1xf32>
    %c1 = arith.constant 1 : index
    %c0_32 = arith.constant 0 : index
    %c0_33 = arith.constant 0 : index
    %68 = vector.load %arg7[%c1, %c0_32, %c0_33] : memref<3x8x1xf32, #tpu.memory_space<vmem>>, vector<1x8x1xf32>
    %69 = vector.shape_cast %68 : vector<1x8x1xf32> to vector<8x1xf32>
    %70 = arith.maximumf %69, %67 : vector<8x1xf32>
    %71 = vector.broadcast %70 : vector<8x1xf32> to vector<8x8xf32>
    %72 = arith.subf %60, %71 : vector<8x8xf32>
    %73 = math.exp %72 : vector<8x8xf32>
    %cst_34 = arith.constant dense<0.000000e+00> : vector<8xf32>
    %74 = vector.multi_reduction <add>, %73, %cst_34 [1] : vector<8x8xf32> to vector<8xf32>
    %75 = vector.shape_cast %74 : vector<8xf32> to vector<8x1xf32>
    %76 = vector.broadcast %70 : vector<8x1xf32> to vector<8x8xf32>
    %77 = arith.subf %62, %76 : vector<8x8xf32>
    %78 = math.exp %77 : vector<8x8xf32>
    %cst_35 = arith.constant dense<0.000000e+00> : vector<8xf32>
    %79 = vector.multi_reduction <add>, %78, %cst_35 [1] : vector<8x8xf32> to vector<8xf32>
    %80 = vector.shape_cast %79 : vector<8xf32> to vector<8x1xf32>
    %81 = arith.addf %75, %80 : vector<8x1xf32>
    %c1_36 = arith.constant 1 : index
    %c0_37 = arith.constant 0 : index
    %c0_38 = arith.constant 0 : index
    %82 = vector.load %arg7[%c1_36, %c0_37, %c0_38] : memref<3x8x1xf32, #tpu.memory_space<vmem>>, vector<1x8x1xf32>
    %83 = vector.shape_cast %82 : vector<1x8x1xf32> to vector<8x1xf32>
    %84 = vector.shape_cast %70 : vector<8x1xf32> to vector<1x8x1xf32>
    tpu.vector_store %arg7[%c1_36, %c0_37, %c0_38], %84 {strides = array<i32>} : memref<3x8x1xf32, #tpu.memory_space<vmem>>, vector<1x8x1xf32>,
    %c1_39 = arith.constant 1 : index
    %c0_40 = arith.constant 0 : index
    %c0_41 = arith.constant 0 : index
    %85 = vector.load %arg8[%c1_39, %c0_40, %c0_41] : memref<3x8x1xf32, #tpu.memory_space<vmem>>, vector<1x8x1xf32>
    %86 = vector.shape_cast %85 : vector<1x8x1xf32> to vector<8x1xf32>
    %87 = arith.subf %69, %70 : vector<8x1xf32>
    %88 = math.exp %87 : vector<8x1xf32>
    %89 = arith.mulf %86, %88 : vector<8x1xf32>
    %90 = arith.addf %89, %81 : vector<8x1xf32>
    %c1_42 = arith.constant 1 : index
    %c0_43 = arith.constant 0 : index
    %c0_44 = arith.constant 0 : index
    %91 = vector.load %arg8[%c1_42, %c0_43, %c0_44] : memref<3x8x1xf32, #tpu.memory_space<vmem>>, vector<1x8x1xf32>
    %92 = vector.shape_cast %91 : vector<1x8x1xf32> to vector<8x1xf32>
    %93 = vector.shape_cast %90 : vector<8x1xf32> to vector<1x8x1xf32>
    tpu.vector_store %arg8[%c1_42, %c0_43, %c0_44], %93 {strides = array<i32>} : memref<3x8x1xf32, #tpu.memory_space<vmem>>, vector<1x8x1xf32>,
    %cst_45 = arith.constant dense<0.000000e+00> : vector<8x8xf32>
    %94 = tpu.matmul %5, %6, %cst_45 {dimension_numbers = #tpu.dot_dimension_numbers<[1], [1], [0], [0], [0, 0, 1, 0], [], []>} : vector<8x32xf32>, vector<8x32xf32>, vector<8x8xf32> -> vector<8x8xf32>
    %95 = arith.addf %8, %94 : vector<8x8xf32>
    %cst_46 = arith.constant dense<0.000000e+00> : vector<8x8xf32>
    %96 = tpu.matmul %5, %7, %cst_46 {dimension_numbers = #tpu.dot_dimension_numbers<[1], [1], [0], [0], [0, 0, 1, 0], [], []>} : vector<8x32xf32>, vector<8x32xf32>, vector<8x8xf32> -> vector<8x8xf32>
    %97 = arith.addf %9, %96 : vector<8x8xf32>
    %cst_47 = arith.constant dense<0xFF800000> : vector<8xf32>
    %98 = vector.multi_reduction <maximumf>, %95, %cst_47 [1] : vector<8x8xf32> to vector<8xf32>
    %99 = vector.shape_cast %98 : vector<8xf32> to vector<8x1xf32>
    %cst_48 = arith.constant dense<0xFF800000> : vector<8xf32>
    %100 = vector.multi_reduction <maximumf>, %97, %cst_48 [1] : vector<8x8xf32> to vector<8xf32>
    %101 = vector.shape_cast %100 : vector<8xf32> to vector<8x1xf32>
    %102 = arith.maximumf %99, %101 : vector<8x1xf32>
    %c2 = arith.constant 2 : index
    %c0_49 = arith.constant 0 : index
    %c0_50 = arith.constant 0 : index
    %103 = vector.load %arg7[%c2, %c0_49, %c0_50] : memref<3x8x1xf32, #tpu.memory_space<vmem>>, vector<1x8x1xf32>
    %104 = vector.shape_cast %103 : vector<1x8x1xf32> to vector<8x1xf32>
    %105 = arith.maximumf %104, %102 : vector<8x1xf32>
    %106 = vector.broadcast %105 : vector<8x1xf32> to vector<8x8xf32>
    %107 = arith.subf %95, %106 : vector<8x8xf32>
    %108 = math.exp %107 : vector<8x8xf32>
    %cst_51 = arith.constant dense<0.000000e+00> : vector<8xf32>
    %109 = vector.multi_reduction <add>, %108, %cst_51 [1] : vector<8x8xf32> to vector<8xf32>
    %110 = vector.shape_cast %109 : vector<8xf32> to vector<8x1xf32>
    %111 = vector.broadcast %105 : vector<8x1xf32> to vector<8x8xf32>
    %112 = arith.subf %97, %111 : vector<8x8xf32>
    %113 = math.exp %112 : vector<8x8xf32>
    %cst_52 = arith.constant dense<0.000000e+00> : vector<8xf32>
    %114 = vector.multi_reduction <add>, %113, %cst_52 [1] : vector<8x8xf32> to vector<8xf32>
    %115 = vector.shape_cast %114 : vector<8xf32> to vector<8x1xf32>
    %116 = arith.addf %110, %115 : vector<8x1xf32>
    %c2_53 = arith.constant 2 : index
    %c0_54 = arith.constant 0 : index
    %c0_55 = arith.constant 0 : index
    %117 = vector.load %arg7[%c2_53, %c0_54, %c0_55] : memref<3x8x1xf32, #tpu.memory_space<vmem>>, vector<1x8x1xf32>
    %118 = vector.shape_cast %117 : vector<1x8x1xf32> to vector<8x1xf32>
    %119 = vector.shape_cast %105 : vector<8x1xf32> to vector<1x8x1xf32>
    tpu.vector_store %arg7[%c2_53, %c0_54, %c0_55], %119 {strides = array<i32>} : memref<3x8x1xf32, #tpu.memory_space<vmem>>, vector<1x8x1xf32>,
    %c2_56 = arith.constant 2 : index
    %c0_57 = arith.constant 0 : index
    %c0_58 = arith.constant 0 : index
    %120 = vector.load %arg8[%c2_56, %c0_57, %c0_58] : memref<3x8x1xf32, #tpu.memory_space<vmem>>, vector<1x8x1xf32>
    %121 = vector.shape_cast %120 : vector<1x8x1xf32> to vector<8x1xf32>
    %122 = arith.subf %104, %105 : vector<8x1xf32>
    %123 = math.exp %122 : vector<8x1xf32>
    %124 = arith.mulf %121, %123 : vector<8x1xf32>
    %125 = arith.addf %124, %116 : vector<8x1xf32>
    %c2_59 = arith.constant 2 : index
    %c0_60 = arith.constant 0 : index
    %c0_61 = arith.constant 0 : index
    %126 = vector.load %arg8[%c2_59, %c0_60, %c0_61] : memref<3x8x1xf32, #tpu.memory_space<vmem>>, vector<1x8x1xf32>
    %127 = vector.shape_cast %126 : vector<1x8x1xf32> to vector<8x1xf32>
    %128 = vector.shape_cast %125 : vector<8x1xf32> to vector<1x8x1xf32>
    tpu.vector_store %arg8[%c2_59, %c0_60, %c0_61], %128 {strides = array<i32>} : memref<3x8x1xf32, #tpu.memory_space<vmem>>, vector<1x8x1xf32>,
    %c0_i32_62 = arith.constant 0 : i32
    %129 = arith.cmpi eq, %arg1, %c0_i32_62 : i32
    %130 = arith.extui %129 : i1 to i32
    %c0_i32_63 = arith.constant 0 : i32
    %131 = arith.cmpi ne, %130, %c0_i32_63 : i32
    scf.if %131 {
      %c0_64 = arith.constant 0 : index
      %c0_65 = arith.constant 0 : index
      %132 = vector.load %arg3[%c0_64, %c0_65] : memref<8x32xf32, #tpu.memory_space<vmem>>, vector<8x32xf32>
      %133 = tpu.iota {dimensions = array<i32: 2>} : vector<1x1x128xi32>
      %cst_66 = arith.constant 0.000000e+00 : f32
      %134 = vector.broadcast %cst_66 : f32 to vector<1x8x128xf32>
      %cst_67 = arith.constant 0.000000e+00 : f32
      %135 = vector.broadcast %cst_67 : f32 to vector<8x1xf32>
      %136 = tpu.iota {dimensions = array<i32: 1>} : vector<1x32xi32>
      %c8_i32_68 = arith.constant 8 : i32
      %137 = vector.broadcast %c8_i32_68 : i32 to vector<1x32xi32>
      %138 = arith.cmpi slt, %136, %137 : vector<1x32xi32>
      %cst_69 = arith.constant 0.000000e+00 : f32
      %139 = vector.shape_cast %138 : vector<1x32xi1> to vector<1x32xi1>
      %140 = vector.broadcast %139 : vector<1x32xi1> to vector<8x32xi1>
      %141 = vector.broadcast %cst_69 : f32 to vector<8x32xf32>
      %142 = arith.select %140, %5, %141 : vector<8x32xi1>, vector<8x32xf32>
      %143 = arith.mulf %142, %132 : vector<8x32xf32>
      %cst_70 = arith.constant dense<0.000000e+00> : vector<8xf32>
      %144 = vector.multi_reduction <add>, %143, %cst_70 [1] : vector<8x32xf32> to vector<8xf32>
      %145 = vector.shape_cast %144 : vector<8xf32> to vector<8x1xf32>
      %146 = arith.addf %135, %145 : vector<8x1xf32>
      %c0_71 = arith.constant 0 : index
      %c0_72 = arith.constant 0 : index
      %c0_73 = arith.constant 0 : index
      %147 = vector.load %arg7[%c0_71, %c0_72, %c0_73] : memref<3x8x1xf32, #tpu.memory_space<vmem>>, vector<1x8x1xf32>
      %148 = vector.shape_cast %147 : vector<1x8x1xf32> to vector<8x1xf32>
      %c0_74 = arith.constant 0 : index
      %c0_75 = arith.constant 0 : index
      %c0_76 = arith.constant 0 : index
      %149 = vector.load %arg8[%c0_74, %c0_75, %c0_76] : memref<3x8x1xf32, #tpu.memory_space<vmem>>, vector<1x8x1xf32>
      %150 = vector.shape_cast %149 : vector<1x8x1xf32> to vector<8x1xf32>
      %151 = math.log %150 : vector<8x1xf32>
      %152 = arith.addf %148, %151 : vector<8x1xf32>
      %153 = arith.subf %152, %146 : vector<8x1xf32>
      %154 = vector.shape_cast %153 : vector<8x1xf32> to vector<1x8x1xf32>
      %cst_77 = arith.constant dense<0.000000e+00> : vector<1xf32>
      %155 = vector.multi_reduction <add>, %154, %cst_77 [1, 2] : vector<1x8x1xf32> to vector<1xf32>
      %156 = vector.shape_cast %155 : vector<1xf32> to vector<1x1x1xf32>
      %157 = vector.extract %156[0, 0, 0] : f32 from vector<1x1x1xf32>
      %c0_i32_78 = arith.constant 0 : i32
      %158 = vector.broadcast %c0_i32_78 : i32 to vector<1x1x128xi32>
      %159 = arith.cmpi eq, %133, %158 : vector<1x1x128xi32>
      %cst_79 = arith.constant 0.000000e+00 : f32
      %160 = vector.broadcast %157 : f32 to vector<1x1x128xf32>
      %161 = vector.broadcast %cst_79 : f32 to vector<1x1x128xf32>
      %162 = arith.select %159, %160, %161 : vector<1x1x128xi1>, vector<1x1x128xf32>
      %163 = vector.broadcast %162 : vector<1x1x128xf32> to vector<1x8x128xf32>
      %164 = arith.addf %134, %163 : vector<1x8x128xf32>
      %165 = tpu.iota {dimensions = array<i32: 1>} : vector<1x32xi32>
      %c16_i32_80 = arith.constant 16 : i32
      %166 = vector.broadcast %c16_i32_80 : i32 to vector<1x32xi32>
      %167 = arith.cmpi slt, %165, %166 : vector<1x32xi32>
      %cst_81 = arith.constant 0.000000e+00 : f32
      %168 = vector.shape_cast %167 : vector<1x32xi1> to vector<1x32xi1>
      %169 = vector.broadcast %168 : vector<1x32xi1> to vector<8x32xi1>
      %170 = vector.broadcast %cst_81 : f32 to vector<8x32xf32>
      %171 = arith.select %169, %5, %170 : vector<8x32xi1>, vector<8x32xf32>
      %172 = arith.mulf %171, %132 : vector<8x32xf32>
      %cst_82 = arith.constant dense<0.000000e+00> : vector<8xf32>
      %173 = vector.multi_reduction <add>, %172, %cst_82 [1] : vector<8x32xf32> to vector<8xf32>
      %174 = vector.shape_cast %173 : vector<8xf32> to vector<8x1xf32>
      %175 = arith.addf %135, %174 : vector<8x1xf32>
      %c1_83 = arith.constant 1 : index
      %c0_84 = arith.constant 0 : index
      %c0_85 = arith.constant 0 : index
      %176 = vector.load %arg7[%c1_83, %c0_84, %c0_85] : memref<3x8x1xf32, #tpu.memory_space<vmem>>, vector<1x8x1xf32>
      %177 = vector.shape_cast %176 : vector<1x8x1xf32> to vector<8x1xf32>
      %c1_86 = arith.constant 1 : index
      %c0_87 = arith.constant 0 : index
      %c0_88 = arith.constant 0 : index
      %178 = vector.load %arg8[%c1_86, %c0_87, %c0_88] : memref<3x8x1xf32, #tpu.memory_space<vmem>>, vector<1x8x1xf32>
      %179 = vector.shape_cast %178 : vector<1x8x1xf32> to vector<8x1xf32>
      %180 = math.log %179 : vector<8x1xf32>
      %181 = arith.addf %177, %180 : vector<8x1xf32>
      %182 = arith.subf %181, %175 : vector<8x1xf32>
      %183 = vector.shape_cast %182 : vector<8x1xf32> to vector<1x8x1xf32>
      %cst_89 = arith.constant dense<0.000000e+00> : vector<1xf32>
      %184 = vector.multi_reduction <add>, %183, %cst_89 [1, 2] : vector<1x8x1xf32> to vector<1xf32>
      %185 = vector.shape_cast %184 : vector<1xf32> to vector<1x1x1xf32>
      %186 = vector.extract %185[0, 0, 0] : f32 from vector<1x1x1xf32>
      %c1_i32 = arith.constant 1 : i32
      %187 = vector.broadcast %c1_i32 : i32 to vector<1x1x128xi32>
      %188 = arith.cmpi eq, %133, %187 : vector<1x1x128xi32>
      %cst_90 = arith.constant 0.000000e+00 : f32
      %189 = vector.broadcast %186 : f32 to vector<1x1x128xf32>
      %190 = vector.broadcast %cst_90 : f32 to vector<1x1x128xf32>
      %191 = arith.select %188, %189, %190 : vector<1x1x128xi1>, vector<1x1x128xf32>
      %192 = vector.broadcast %191 : vector<1x1x128xf32> to vector<1x8x128xf32>
      %193 = arith.addf %164, %192 : vector<1x8x128xf32>
      %194 = arith.mulf %5, %132 : vector<8x32xf32>
      %cst_91 = arith.constant dense<0.000000e+00> : vector<8xf32>
      %195 = vector.multi_reduction <add>, %194, %cst_91 [1] : vector<8x32xf32> to vector<8xf32>
      %196 = vector.shape_cast %195 : vector<8xf32> to vector<8x1xf32>
      %197 = arith.addf %135, %196 : vector<8x1xf32>
      %c2_92 = arith.constant 2 : index
      %c0_93 = arith.constant 0 : index
      %c0_94 = arith.constant 0 : index
      %198 = vector.load %arg7[%c2_92, %c0_93, %c0_94] : memref<3x8x1xf32, #tpu.memory_space<vmem>>, vector<1x8x1xf32>
      %199 = vector.shape_cast %198 : vector<1x8x1xf32> to vector<8x1xf32>
      %c2_95 = arith.constant 2 : index
      %c0_96 = arith.constant 0 : index
      %c0_97 = arith.constant 0 : index
      %200 = vector.load %arg8[%c2_95, %c0_96, %c0_97] : memref<3x8x1xf32, #tpu.memory_space<vmem>>, vector<1x8x1xf32>
      %201 = vector.shape_cast %200 : vector<1x8x1xf32> to vector<8x1xf32>
      %202 = math.log %201 : vector<8x1xf32>
      %203 = arith.addf %199, %202 : vector<8x1xf32>
      %204 = arith.subf %203, %197 : vector<8x1xf32>
      %205 = vector.shape_cast %204 : vector<8x1xf32> to vector<1x8x1xf32>
      %cst_98 = arith.constant dense<0.000000e+00> : vector<1xf32>
      %206 = vector.multi_reduction <add>, %205, %cst_98 [1, 2] : vector<1x8x1xf32> to vector<1xf32>
      %207 = vector.shape_cast %206 : vector<1xf32> to vector<1x1x1xf32>
      %208 = vector.extract %207[0, 0, 0] : f32 from vector<1x1x1xf32>
      %c2_i32 = arith.constant 2 : i32
      %209 = vector.broadcast %c2_i32 : i32 to vector<1x1x128xi32>
      %210 = arith.cmpi eq, %133, %209 : vector<1x1x128xi32>
      %cst_99 = arith.constant 0.000000e+00 : f32
      %211 = vector.broadcast %208 : f32 to vector<1x1x128xf32>
      %212 = vector.broadcast %cst_99 : f32 to vector<1x1x128xf32>
      %213 = arith.select %210, %211, %212 : vector<1x1x128xi1>, vector<1x1x128xf32>
      %214 = vector.broadcast %213 : vector<1x1x128xf32> to vector<1x8x128xf32>
      %215 = arith.addf %193, %214 : vector<1x8x128xf32>
      %c0_100 = arith.constant 0 : index
      %c0_101 = arith.constant 0 : index
      %c0_102 = arith.constant 0 : index
      %216 = vector.load %arg6[%c0_100, %c0_101, %c0_102] : memref<1x8x128xf32, #tpu.memory_space<vmem>>, vector<1x8x128xf32>
      tpu.vector_store %arg6[%c0_100, %c0_101, %c0_102], %215 {strides = array<i32>} : memref<1x8x128xf32, #tpu.memory_space<vmem>>, vector<1x8x128xf32>,
    } else {
    }
    return
  }
  func.func @transform_0(%arg0: i32, %arg1: i32) -> (i32, i32) {
    %c0_i32 = arith.constant 0 : i32
    %c0_i32_0 = arith.constant 0 : i32
    return %arg0, %c0_i32 : i32, i32
  }
  func.func @transform_1(%arg0: i32, %arg1: i32) -> (i32, i32) {
    %c0_i32 = arith.constant 0 : i32
    %c0_i32_0 = arith.constant 0 : i32
    return %arg0, %c0_i32 : i32, i32
  }
  func.func @transform_2(%arg0: i32, %arg1: i32) -> (i32, i32) {
    %c0_i32 = arith.constant 0 : i32
    %c0_i32_0 = arith.constant 0 : i32
    return %arg1, %c0_i32 : i32, i32
  }
  func.func @transform_3(%arg0: i32, %arg1: i32) -> (i32, i32) {
    %c0_i32 = arith.constant 0 : i32
    %c0_i32_0 = arith.constant 0 : i32
    return %arg1, %c0_i32 : i32, i32
  }
  func.func @transform_4(%arg0: i32, %arg1: i32) -> (i32, i32, i32) {
    %c0_i32 = arith.constant 0 : i32
    %c0_i32_0 = arith.constant 0 : i32
    %c0_i32_1 = arith.constant 0 : i32
    return %arg0, %c0_i32, %c0_i32_0 : i32, i32, i32
  }
}

</mosaic_0001>

<bundles_post_ra>
// kernel: tpu_custom_call.1
= control target key start
LH: loop header
LB: loop body
LE: loop exit
PB: predicated region body
PF: predicated region fallthrough
CT: control target
= control target key end

     0   :  { %9 = vsyncpa [#allocation5], 0  ;;  %s1104_s0 = inlined_call_operand.hbm [shape: f32[8,32], index: 0, kind: input, shape index: {}]   ;;  %s1105_s1 = inlined_call_operand.hbm [shape: f32[8,32], index: 1, kind: input, shape index: {}]   ;;  %s1106_s2 = inlined_call_operand.hbm [shape: f32[8,32], index: 2, kind: input, shape index: {}]   ;;  %s1107_s3 = inlined_call_operand.vmem [shape: f32[8,32], index: 3, kind: input, shape index: {}]   ;;  %s1108_s4 = inlined_call_operand.hbm [shape: f32[1,8,128], index: 4, kind: output, shape index: {}]  }
   0x1   :  { %10 = vsyncpa [#allocation8], 0 }
   0x2   :  { %11 = vsyncpa [#allocation6], 0  ;;  %s909_s15 = smov [#allocation7]   ;;  %s910_s17 = smov [#allocation4]  }
   0x3   :  { %s28_s16 = sshll.u32 %s909_s15, 4  ;;  %s18_s18 = sshll.u32 %s910_s17, 4  ;;  %s29_s16 = int_to_ptr.vmem [resolvable:$true] %s28_s16  ;;  %s19_s18 = int_to_ptr.vmem [resolvable:$true] %s18_s18 }
   0x4   :  { %s815_s21 = scalar_lea.hbm %s1105_s1, 128 }
   0x5   :  { %p816_p0 = scmp.ne.s32.totalorder %s1105_s1, %s815_s21  ;;  %p819_p1 = scmp.lt.u32.totalorder %s815_s21, %s1105_s1 }
   0x7   :  { %p821_p2 = pnand %p819_p1, %p816_p0 }
   0x9   :  { %824 = shalt.err (!%p821_p2)
}
   0xa   :  { %s825_s26 = scalar_lea.vmem %s29_s16, 128  ;;  %p830_p4 = scmp.lt.s32.totalorder %s29_s16, %s29_s16 }
   0xb   :  { %p826_p3 = scmp.ne.s32.totalorder %s29_s16, %s825_s26  ;;  %p831_p5 = scmp.lt.s32.totalorder %s825_s26, %s825_s26 }
   0xd   :  { %p832_p6 = por %p831_p5, %p830_p4 }
   0xf   :  { %p833_p7 = pnand %p832_p6, %p826_p3 }
  0x11   :  { %836 = shalt.err (!%p833_p7)
}
  0x12   :  { %31 = dma.hbm_to_vmem [thread:$0]  %s1105_s1, 128, %s29_s16, [#allocation8]  }
  0x13   :  { %s837_s5 = scalar_lea.hbm %s1104_s0, 128 }
  0x14   :  { %p838_p8 = scmp.ne.s32.totalorder %s1104_s0, %s837_s5  ;;  %p841_p9 = scmp.lt.u32.totalorder %s837_s5, %s1104_s0 }
  0x16   :  { %p843_p10 = pnand %p841_p9, %p838_p8 }
  0x18   :  { %846 = shalt.err (!%p843_p10)
}
  0x19   :  { %s847_s10 = scalar_lea.vmem %s19_s18, 128  ;;  %p852_p12 = scmp.lt.s32.totalorder %s19_s18, %s19_s18 }
  0x1a   :  { %p848_p11 = scmp.ne.s32.totalorder %s19_s18, %s847_s10  ;;  %p853_p13 = scmp.lt.s32.totalorder %s847_s10, %s847_s10 }
  0x1c   :  { %p854_p0 = por %p853_p13, %p852_p12 }
  0x1e   :  { %p855_p1 = pnand %p854_p0, %p848_p11 }
  0x20   :  { %858 = shalt.err (!%p855_p1)
}
  0x21   :  { %21 = dma.hbm_to_vmem [thread:$0]  %s1104_s0, 128, %s19_s18, [#allocation5]  }
  0x22   :  { %s911_s12 = smov [#allocation9]   ;;  %s859_s16 = scalar_lea.hbm %s1106_s2, 128 }
  0x23   :  { %s38_s13 = sshll.u32 %s911_s12, 4  ;;  %p860_p2 = scmp.ne.s32.totalorder %s1106_s2, %s859_s16  ;;  %s39_s13 = int_to_ptr.vmem [resolvable:$true] %s38_s13 }
  0x24   :  { %p863_p3 = scmp.lt.u32.totalorder %s859_s16, %s1106_s2 }
  0x26   :  { %p865_p4 = pnand %p863_p3, %p860_p2 }
  0x28   :  { %868 = shalt.err (!%p865_p4)
}
  0x29   :  { %s869_s22 = scalar_lea.vmem %s39_s13, 128  ;;  %p874_p6 = scmp.lt.s32.totalorder %s39_s13, %s39_s13 }
  0x2a   :  { %p870_p5 = scmp.ne.s32.totalorder %s39_s13, %s869_s22  ;;  %p875_p7 = scmp.lt.s32.totalorder %s869_s22, %s869_s22 }
  0x2c   :  { %p876_p8 = por %p875_p7, %p874_p6 }
  0x2e   :  { %p877_p9 = pnand %p876_p8, %p870_p5 }
  0x30   :  { %880 = shalt.err (!%p877_p9)
}
  0x31   :  { %41 = dma.hbm_to_vmem [thread:$0]  %s1106_s2, 128, %s39_s13, [#allocation8]  }
  0x32   :  { %903 = dma.done.wait [#allocation5], 128  }
  0x33   :  { %904 = vsyncadd [#allocation5], 4294967168 }
  0x34   :  { %905 = dma.done.wait [#allocation8], 256  }
  0x35   :  { %906 = vsyncadd [#allocation8], 4294967040  ;;  %v68_v0 = vlaneseq  ;;  %v912_v1 = vmov 0.0   ;;  %vm913_vm0 = vmmov 0   ;;  %vm74_vm1 = vcmask 261120   ;;  %v66_v3 = vld [vmem:[#allocation9] sm:$0xff] }
  0x36   :  { %745 = vmatprep.subr.mxu0 %v912_v1  ;;  %747 = vmatprep.mubr.msk.f32.mxu0 %vm913_vm0, %v912_v1  ;;  %v64_v4 = vld [vmem:[#allocation4] sm:$0xff]  ;;  %v67_v5 = vld [vmem:[%s1107_s3] sm:$0xff]  ;;  %vm224_vm4 = vcmask 64512   ;;  %vm57_vm5 = vcmask 7168   ;;  %v914_v27 = vmov -inf   ;;  %v915_v28 = vmov 0  }
  0x37   :  { %750 = vmatprep.subr.mxu1 %v912_v1  ;;  %752 = vmatprep.mubr.msk.f32.mxu1 %vm913_vm0, %v912_v1  ;;  %v984_v2 = vand.u32 127, %v68_v0  ;;  %v991_v6 = vmul.f32 20.0, %v64_v4  ;;  %58 = vst.msk [vmem:[#allocation2] sm:$0xff] %vm57_vm5, %v914_v27  ;;  %59 = vst.msk [vmem:[#allocation2 + $0x8] sm:$0xff] %vm57_vm5, %v914_v27  ;;  %v628_v61 = vld [vmem:[#allocation7] sm:$0xff]  ;;  %s916_s26 = smov [#allocation10]  }
  0x38   :  { %746 = vmatpush3.xpose.msk.msra.mxu0 %vm74_vm1, %v66_v3  ;;  %751 = vmatpush3.xpose.msk.msra.mxu1 %vm74_vm1, %v67_v5  ;;  %60 = vst.msk [vmem:[#allocation2 + $0x10] sm:$0xff] %vm57_vm5, %v914_v27  ;;  %61 = vst.msk [vmem:[#allocation3] sm:$0xff] %vm57_vm5, %v912_v1  ;;  %s711_s27 = sshll.u32 %s916_s26, 4  ;;  %s712_s27 = int_to_ptr.vmem [resolvable:$true] %s711_s27 }
  0x39   :  { %vm70_vm2 = vcmp.lt.s32.totalorder %v984_v2, 8  ;;  %755 = vmatprep.subr.mxu0 %v912_v1  ;;  %vm261_vm3 = vcmp.lt.s32.totalorder %v984_v2, 16  ;;  %760 = vmatprep.subr.mxu1 %v912_v1  ;;  %62 = vst.msk [vmem:[#allocation3 + $0x8] sm:$0xff] %vm57_vm5, %v912_v1  ;;  %63 = vst.msk [vmem:[#allocation3 + $0x10] sm:$0xff] %vm57_vm5, %v912_v1  ;;  %vm675_vm6 = vcmp.eq.s32.totalorder %v984_v2, 1  ;;  %vm650_vm7 = vcmp.eq.s32.totalorder %v984_v2, 0  ;;  %p886_p11 = scmp.lt.s32.totalorder %s712_s27, %s712_s27 }
  0x3a   :  { %v998_v7 = vsel %vm70_vm2, %v991_v6, 0.0  ;;  %v1008_v8 = vsel %vm261_vm3, %v991_v6, 0.0  ;;  %789 = vset.pattern.permute.xlu0 %v915_v28  ;;  %790 = vset.pattern.permute.xlu1 %v915_v28  ;;  %vm700_vm8 = vcmp.eq.s32.totalorder %v984_v2, 2  ;;  %s881_s28 = scalar_lea.vmem %s712_s27, 128 }
  0x3b   :  { %748 = vmatmul.mubr.msk.f32.vlgmr.msra.gmra.mrb[0].mxu0 %vm74_vm1, %v998_v7  ;;  %753 = vmatmul.mubr.msk.f32.vlgmr.msra.gmra.mrb[0].mxu1 %vm74_vm1, %v998_v7  ;;  %v654_v0 = vmul.f32 %v628_v61, %v1008_v8  ;;  %p882_p10 = scmp.ne.s32.totalorder %s712_s27, %s881_s28  ;;  %p887_p12 = scmp.lt.s32.totalorder %s881_s28, %s881_s28 }
  0x3c   :  { %756 = vmatpush3.xpose.msk.msra.mxu0 %vm74_vm1, %v66_v3  ;;  %757 = vmatprep.mubr.msk.f32.mxu0 %vm913_vm0, %v912_v1 }
  0x3d   :  { %761 = vmatpush3.xpose.msk.msra.mxu1 %vm74_vm1, %v67_v5  ;;  %762 = vmatprep.mubr.msk.f32.mxu1 %vm913_vm0, %v912_v1  ;;  %p888_p13 = por %p887_p12, %p886_p11 }
  0x3e   :  { %765 = vmatprep.subr.mxu0 %v912_v1  ;;  %770 = vmatprep.subr.mxu1 %v912_v1  ;;  %v1047_v31 = vld [vmem:[#allocation2] sm:$0xff]  ;;  %v1052_v36 = vld [vmem:[#allocation2 + $0x8] sm:$0xff] }
  0x3f   :  { %758 = vmatmul.mubr.msk.f32.vlgmr.msra.gmra.mrb[2].mxu0 %vm74_vm1, %v1008_v8  ;;  %v1060_v42 = vld [vmem:[#allocation2 + $0x10] sm:$0xff]  ;;  %p889_p0 = pnand %p888_p13, %p882_p10 }
  0x40   :  { %763 = vmatmul.mubr.msk.f32.vlgmr.msra.gmra.mrb[2].mxu1 %vm74_vm1, %v1008_v8  ;;  %766 = vmatpush3.xpose.msk.msra.mxu0 %vm74_vm1, %v66_v3 }
  0x41   :  { %771 = vmatpush3.xpose.msk.msra.mxu1 %vm74_vm1, %v67_v5  ;;  %767 = vmatprep.mubr.msk.f32.mxu0 %vm913_vm0, %v912_v1 }
  0x42   :  { %772 = vmatprep.mubr.msk.f32.mxu1 %vm913_vm0, %v912_v1 }
  0x43   :  { %768 = vmatmul.mubr.msk.f32.vlgmr.msra.gmra.mrb[4].mxu0 %vm74_vm1, %v991_v6 }
  0x44   :  { %773 = vmatmul.mubr.msk.f32.vlgmr.msra.gmra.mrb[4].mxu1 %vm74_vm1, %v991_v6 }
 0x10e   :  { %v147_v9 = vpop.f32.mrb[0].mxu0  ;;  %v220_v10 = vpop.f32.mrb[0].mxu1 }
 0x10f   :  { %v749_v11 = vpop.f32.mrb[1].mxu0  ;;  %v225_v12 = vsel %vm224_vm4, %v147_v9, -inf  ;;  %v754_v13 = vpop.f32.mrb[1].mxu1  ;;  %v228_v14 = vsel %vm224_vm4, %v220_v10, -inf }
 0x110   :  { %226 = vmax.xlane.f32.xlu0 %v225_v12 }
 0x112   :  { %v334_v15 = vpop.f32.mrb[2].mxu0 }
 0x113   :  { %v759_v16 = vpop.f32.mrb[3].mxu0  ;;  %v408_v17 = vsel %vm224_vm4, %v334_v15, -inf  ;;  %v404_v18 = vpop.f32.mrb[2].mxu1 }
 0x114   :  { %229 = vmax.xlane.f32.xlu0 %v228_v14  ;;  %409 = vmax.xlane.f32.xlu1 %v408_v17  ;;  %v764_v19 = vpop.f32.mrb[3].mxu1  ;;  %v411_v20 = vsel %vm224_vm4, %v404_v18, -inf }
 0x116   :  { %v514_v21 = vpop.f32.mrb[4].mxu0 }
 0x117   :  { %v1033_v22 = vpop.f32.mrb[4].mxu1  ;;  %v588_v23 = vsel %vm224_vm4, %v514_v21, -inf  ;;  %v769_v24 = vpop.f32.mrb[5].mxu0 }
 0x118   :  { %412 = vmax.xlane.f32.xlu1 %v411_v20  ;;  %589 = vmax.xlane.f32.xlu0 %v588_v23  ;;  %v774_v25 = vpop.f32.mrb[5].mxu1  ;;  %v591_v26 = vsel %vm224_vm4, %v1033_v22, -inf }
 0x11c   :  { %592 = vmax.xlane.f32.xlu1 %v591_v26 }
 0x19d   :  { %v227_v29 = vpop.xlane.xlu0 %226 }
 0x1a1   :  { %v230_v30 = vpop.xlane.xlu0 %229  ;;  %v410_v32 = vpop.xlane.xlu1 %409 }
 0x1a2   :  { %v231_v33 = vmax.f32 %v227_v29, %v230_v30  ;;  %v438_v30 = vld [vmem:[#allocation3 + $0x8] sm:$0xff] }
 0x1a4   :  { %v1050_v34 = vmax.f32 %v1047_v31, %v231_v33 }
 0x1a5   :  { %v413_v35 = vpop.xlane.xlu1 %412  ;;  %v590_v39 = vpop.xlane.xlu0 %589 }
 0x1a6   :  { %253 = vst.msk [vmem:[#allocation2] sm:$0xff] %vm57_vm5, %v1050_v34  ;;  %v255_v37 = vsub.f32 %v1047_v31, %v1050_v34  ;;  %v414_v38 = vmax.f32 %v410_v32, %v413_v35  ;;  %236 = vperm.xlu0 %789, %v1050_v34  }
 0x1a8   :  { %v417_v40 = vmax.f32 %v1052_v36, %v414_v38  ;;  %v256_v20 = vmul.f32 1.442695, %v255_v37  ;;  %v618_v38 = vld [vmem:[#allocation3 + $0x10] sm:$0xff] }
 0x1a9   :  { %v593_v41 = vpop.xlane.xlu1 %592 }
 0x1aa   :  { %436 = vst.msk [vmem:[#allocation2 + $0x8] sm:$0xff] %vm57_vm5, %v417_v40  ;;  %v439_v43 = vsub.f32 %v1052_v36, %v417_v40  ;;  %v594_v44 = vmax.f32 %v590_v39, %v593_v41  ;;  %420 = vperm.xlu1 %790, %v417_v40  }
 0x1ac   :  { %v597_v45 = vmax.f32 %v1060_v42, %v594_v44 }
 0x1ae   :  { %616 = vst.msk [vmem:[#allocation2 + $0x10] sm:$0xff] %vm57_vm5, %v597_v45  ;;  %v619_v46 = vsub.f32 %v1060_v42, %v597_v45  ;;  %600 = vperm.xlu1 %790, %v597_v45  }
 0x1b0   :  { %v620_v23 = vmul.f32 1.442695, %v619_v46 }
 0x225   :  { %v237_v47 = vpop.permute.xlu0 %236 }
 0x226   :  { %v239_v48 = vsub.f32 %v147_v9, %v237_v47  ;;  %v245_v49 = vsub.f32 %v220_v10, %v237_v47  ;;  %v655_v9 = vsel %vm74_vm1, %v654_v0, 0.0  ;;  %v634_v47 = vld [vmem:[#allocation2] sm:$0xff] }
 0x228   :  { %v240_v50 = vmul.f32 1.442695, %v239_v48  ;;  %v246_v51 = vmul.f32 1.442695, %v245_v49 }
 0x229   :  { %v421_v52 = vpop.permute.xlu1 %420 }
 0x22a   :  { %791 = vpow2.f32 %v240_v50  ;;  %v423_v53 = vsub.f32 %v334_v15, %v421_v52  ;;  %v429_v54 = vsub.f32 %v404_v18, %v421_v52  ;;  %v629_v15 = vmul.f32 %v628_v61, %v998_v7  ;;  %v254_v7 = vld [vmem:[#allocation3] sm:$0xff] }
 0x22b   :  { %793 = vpow2.f32 %v246_v51  ;;  %v679_v18 = vmul.f32 %v628_v61, %v991_v6  ;;  %v684_v61 = vld [vmem:[#allocation2 + $0x10] sm:$0xff] }
 0x22c   :  { %v424_v55 = vmul.f32 1.442695, %v423_v53  ;;  %v430_v56 = vmul.f32 1.442695, %v429_v54  ;;  %v630_v17 = vsel %vm74_vm1, %v629_v15, 0.0  ;;  %v659_v54 = vld [vmem:[#allocation2 + $0x8] sm:$0xff] }
 0x22d   :  { %v601_v57 = vpop.permute.xlu1 %600  ;;  %v680_v19 = vsel %vm74_vm1, %v679_v18, 0.0 }
 0x22e   :  { %795 = vpow2.f32 %v424_v55  ;;  %v603_v58 = vsub.f32 %v514_v21, %v601_v57  ;;  %v609_v60 = vsub.f32 %v1033_v22, %v601_v57  ;;  %v440_v21 = vmul.f32 1.442695, %v439_v43 }
 0x22f   :  { %797 = vpow2.f32 %v430_v56 }
 0x230   :  { %v604_v59 = vmul.f32 1.442695, %v603_v58  ;;  %v610_v63 = vmul.f32 1.442695, %v609_v60 }
 0x232   :  { %799 = vpow2.f32 %v604_v59 }
 0x233   :  { %801 = vpow2.f32 %v610_v63 }
 0x234   :  { %v792_v62 = vpop.eup %791  ;;  %803 = vpow2.f32 %v256_v20 }
 0x235   :  { %v794_v1 = vpop.eup %793  ;;  %v242_v3 = vsel %vm224_vm4, %v792_v62, 0.0  ;;  %805 = vpow2.f32 %v440_v21 }
 0x236   :  { %v248_v4 = vsel %vm224_vm4, %v794_v1, 0.0  ;;  %243 = vadd.xlane.f32.xlu1 %v242_v3  ;;  %807 = vpow2.f32 %v620_v23 }
 0x237   :  { %249 = vadd.xlane.f32.xlu0 %v248_v4 }
 0x238   :  { %v796_v5 = vpop.eup %795 }
 0x239   :  { %v426_v10 = vsel %vm224_vm4, %v796_v5, 0.0  ;;  %v798_v11 = vpop.eup %797 }
 0x23a   :  { %427 = vadd.xlane.f32.xlu1 %v426_v10  ;;  %v432_v12 = vsel %vm224_vm4, %v798_v11, 0.0 }
 0x23b   :  { %656 = vadd.xlane.f32.xlu0 %v655_v9 }
 0x23c   :  { %v800_v13 = vpop.eup %799 }
 0x23d   :  { %v606_v8 = vsel %vm224_vm4, %v800_v13, 0.0  ;;  %v802_v14 = vpop.eup %801 }
 0x23e   :  { %433 = vadd.xlane.f32.xlu1 %v432_v12  ;;  %v612_v16 = vsel %vm224_vm4, %v802_v14, 0.0  ;;  %v804_v22 = vpop.eup %803 }
 0x23f   :  { %v258_v27 = vmul.f32 %v804_v22, %v254_v7  ;;  %v806_v29 = vpop.eup %805 }
 0x240   :  { %v442_v31 = vmul.f32 %v806_v29, %v438_v30  ;;  %v808_v37 = vpop.eup %807 }
 0x241   :  { %v622_v40 = vmul.f32 %v808_v37, %v618_v38 }
 0x242   :  { %607 = vadd.xlane.f32.xlu1 %v606_v8 }
 0x246   :  { %613 = vadd.xlane.f32.xlu1 %v612_v16 }
 0x24a   :  { %631 = vadd.xlane.f32.xlu1 %v630_v17 }
 0x24e   :  { %681 = vadd.xlane.f32.xlu1 %v680_v19 }
 0x2c3   :  { %v244_v24 = vpop.xlane.xlu1 %243 }
 0x2c4   :  { %v250_v25 = vpop.xlane.xlu0 %249 }
 0x2c5   :  { %v251_v26 = vadd.f32 %v250_v25, %v244_v24 }
 0x2c7   :  { %v259_v6 = vadd.f32 %v258_v27, %v251_v26  ;;  %v428_v28 = vpop.xlane.xlu1 %427 }
 0x2c8   :  { %v657_v55 = vpop.xlane.xlu0 %656 }
 0x2c9   :  { %260 = vst.msk [vmem:[#allocation3] sm:$0xff] %vm57_vm5, %v259_v6 }
 0x2cb   :  { %v434_v32 = vpop.xlane.xlu1 %433 }
 0x2cc   :  { %v435_v33 = vadd.f32 %v434_v32, %v428_v28 }
 0x2ce   :  { %v443_v34 = vadd.f32 %v442_v31, %v435_v33 }
 0x2cf   :  { %v608_v35 = vpop.xlane.xlu1 %607 }
 0x2d0   :  { %444 = vst.msk [vmem:[#allocation3 + $0x8] sm:$0xff] %vm57_vm5, %v443_v34  ;;  %v635_v36 = vld [vmem:[#allocation3] sm:$0xff] }
 0x2d1   :  { %809 = vlog2.f32 %v635_v36 }
 0x2d3   :  { %v614_v39 = vpop.xlane.xlu1 %613 }
 0x2d4   :  { %v615_v41 = vadd.f32 %v614_v39, %v608_v35 }
 0x2d6   :  { %v623_v42 = vadd.f32 %v622_v40, %v615_v41 }
 0x2d7   :  { %v660_v43 = vld [vmem:[#allocation3 + $0x8] sm:$0xff]  ;;  %v632_v46 = vpop.xlane.xlu1 %631 }
 0x2d8   :  { %624 = vst.msk [vmem:[#allocation3 + $0x10] sm:$0xff] %vm57_vm5, %v623_v42  ;;  %811 = vlog2.f32 %v660_v43 }
 0x2db   :  { %v810_v44 = vpop.eup %809  ;;  %v682_v62 = vpop.xlane.xlu1 %681 }
 0x2dc   :  { %v637_v45 = vmul.f32 0.6931472, %v810_v44 }
 0x2de   :  { %v638_v48 = vadd.f32 %v637_v45, %v634_v47 }
 0x2df   :  { %v685_v49 = vld [vmem:[#allocation3 + $0x10] sm:$0xff] }
 0x2e0   :  { %v639_v50 = vsub.f32 %v638_v48, %v632_v46  ;;  %813 = vlog2.f32 %v685_v49 }
 0x2e2   :  { %v812_v51 = vpop.eup %811  ;;  %v640_v52 = vsel %vm57_vm5, %v639_v50, 0.0 }
 0x2e3   :  { %641 = vadd.xlane.f32.xlu0 %v640_v52  ;;  %v662_v53 = vmul.f32 0.6931472, %v812_v51 }
 0x2e5   :  { %v663_v56 = vadd.f32 %v662_v53, %v659_v54 }
 0x2e7   :  { %v664_v57 = vsub.f32 %v663_v56, %v657_v55 }
 0x2e9   :  { %v665_v58 = vsel %vm57_vm5, %v664_v57, 0.0 }
 0x2ea   :  { %v814_v59 = vpop.eup %813  ;;  %666 = vadd.xlane.f32.xlu1 %v665_v58 }
 0x2eb   :  { %v687_v60 = vmul.f32 0.6931472, %v814_v59 }
 0x2ed   :  { %v688_v63 = vadd.f32 %v687_v60, %v684_v61 }
 0x2ef   :  { %v689_v0 = vsub.f32 %v688_v63, %v682_v62 }
 0x2f1   :  { %v690_v1 = vsel %vm57_vm5, %v689_v0, 0.0 }
 0x2f2   :  { %691 = vadd.xlane.f32.xlu0 %v690_v1 }
 0x370   :  { %v642_v3 = vpop.xlane.xlu0 %641 }
 0x371   :  { %v643_v4 = vrot.slane %v642_v3, 4 }
 0x373   :  { %v644_v5 = vadd.f32 %v643_v4, %v642_v3 }
 0x375   :  { %v645_v9 = vrot.slane %v644_v5, 2 }
 0x377   :  { %v667_v10 = vpop.xlane.xlu1 %666  ;;  %v646_v11 = vadd.f32 %v645_v9, %v644_v5 }
 0x378   :  { %v668_v12 = vrot.slane %v667_v10, 4 }
 0x379   :  { %v647_v13 = vrot.slane %v646_v11, 1 }
 0x37a   :  { %v669_v8 = vadd.f32 %v668_v12, %v667_v10 }
 0x37b   :  { %v648_v14 = vadd.f32 %v647_v13, %v646_v11 }
 0x37c   :  { %v670_v15 = vrot.slane %v669_v8, 2 }
 0x37d   :  { %775 = vpush %v648_v14 }
 0x37e   :  { %v671_v16 = vadd.f32 %v670_v15, %v669_v8 }
 0x37f   :  { %v692_v17 = vpop.xlane.xlu0 %691 }
 0x380   :  { %v693_v18 = vrot.slane %v692_v17, 4  ;;  %v672_v19 = vrot.slane %v671_v16, 1 }
 0x382   :  { %v694_v20 = vadd.f32 %v693_v18, %v692_v17  ;;  %v673_v21 = vadd.f32 %v672_v19, %v671_v16 }
 0x384   :  { %v695_v22 = vrot.slane %v694_v20, 2  ;;  %777 = vpush %v673_v21 }
 0x386   :  { %v696_v7 = vadd.f32 %v695_v22, %v694_v20 }
 0x388   :  { %v697_v23 = vrot.slane %v696_v7, 1 }
 0x38a   :  { %v698_v24 = vadd.f32 %v697_v23, %v696_v7 }
 0x38c   :  { %779 = vpush %v698_v24 }
 0x3ae   :  { %s776_s3 = spop %775 }
 0x3af   :  { %v651_v26 = vstv %s776_s3 }
 0x3b0   :  { %v652_v6 = vsel %vm650_vm7, %v651_v26, 0.0 }
 0x3b5   :  { %s778_s24 = spop %777 }
 0x3b6   :  { %v676_v25 = vstv %s778_s24 }
 0x3b7   :  { %v677_v27 = vsel %vm675_vm6, %v676_v25, 0.0 }
 0x3b8   :  { %v678_v28 = vadd.f32 %v677_v27, %v652_v6 }
 0x3bd   :  { %s780_s25 = spop %779 }
 0x3be   :  { %v701_v29 = vstv %s780_s25 }
 0x3bf   :  { %v702_v30 = vsel %vm700_vm8, %v701_v29, 0.0 }
 0x3c0   :  { %v703_v32 = vadd.f32 %v702_v30, %v678_v28 }
 0x3c2   :  { %704 = vst [vmem:[#allocation10] sm:$0xff] %v703_v32 }
 0x3c3   :  { %892 = shalt.err (!%p889_p0)
}
 0x3c4   :  { %s893_s5 = scalar_lea.hbm %s1108_s4, 128 }
 0x3c5   :  { %p894_p1 = scmp.ne.s32.totalorder %s1108_s4, %s893_s5  ;;  %p897_p2 = scmp.lt.u32.totalorder %s893_s5, %s1108_s4 }
 0x3c7   :  { %p899_p3 = pnand %p897_p2, %p894_p1 }
 0x3c9   :  { %902 = shalt.err (!%p899_p3)
}
 0x3ca   :  { %714 = dma.vmem_to_hbm [thread:$0]  %s712_s27, 128, %s1108_s4, [#allocation6]  }
 0x3cb   :  { %907 = dma.done.wait [#allocation6], 128  }
 0x3cc   :  { %908 = vsyncadd [#allocation6], 4294967168 }
 0x3cd   :  { %718 = vsyncpa [#allocation5], 1 }
 0x3ce   :  { %719 = vsyncpa [#allocation8], 1 }
 0x3cf   :  { %720 = vsyncpa [#allocation6], 1 }

</bundles_post_ra>
